<compile_context>
chip_gen: v5e
topology: v5e:2x2
jax: 0.10.0
libtpu: 0.0.40
codegen_flags: <defaults>
</compile_context>

<pallas_src>
import math

import jax
import jax.numpy as jnp
from jax import lax
from jax.experimental import pallas as pl
from jax.experimental.pallas import tpu as pltpu


# ---------------------------------------------------------------------------
# Fused whole-block kernel
# ---------------------------------------------------------------------------
def _make_fused_kernel(cfgs, n, h0, w0, eps):
    """Build the fused kernel body.

    Layout convention (everything lives on the base H0 x W0 grid):
      lanes            : n*S0 + a0*W0 + b0   (batch packed into lanes, S0 = H0*W0)
      layer-l activation: 4**l phase planes, each (C_l, N*S0); plane (py, px) holds
                          y[c, a', b'] with a' = 2**l * a0 + py, b' = 2**l * b0 + px.
    """
    s0 = h0 * w0
    ns = n * s0
    n_layers = len(cfgs)

    def kernel(*refs):
        # ---- parse refs: x, per-layer params, output, per-hidden-layer scratch ----
        i = 0
        x_ref = refs[i]; i += 1
        params = []
        for cfg in cfgs:
            k = 4 if cfg["bn"] else 2
            params.append(refs[i:i + k]); i += k
        o_ref = refs[i]; i += 1
        scratch = refs[i:]

        def boundary_masks(rows):
            lane = lax.broadcasted_iota(jnp.int32, (rows, ns), 1)
            loc = lane % s0                              # per-image lane index
            col_ok = (loc % w0) != (w0 - 1)              # b0 + 1 < W0
            row_ok = loc < (h0 - 1) * w0                 # a0 + 1 < H0
            return col_ok, row_ok

        def shifted(plane_fn, p_sz, py, px, da, db, col_ok, row_ok):
            """Activation shifted by (+da, +db) in FULL-resolution coordinates,
            expressed on the base grid: phase relabel + (only on wrap) lane roll."""
            if py + da < p_sz:
                pys, ra = py + da, 0
            else:
                pys, ra = 0, 1
            if px + db < p_sz:
                pxs, rb = px + db, 0
            else:
                pxs, rb = 0, 1
            v = plane_fn(pys, pxs)
            sh = ra * w0 + rb
            if sh == 0:
                return v
            v = pltpu.roll(v, ns - sh, 1)                # fetch lane + sh (XLU)
            if ra and rb:
                m = jnp.logical_and(row_ok, col_ok)
            elif ra:
                m = row_ok
            else:
                m = col_ok
            return jnp.where(m, v, 0.0)

        prev_scratch = None
        for l, cfg in enumerate(cfgs):
            cin, cout, has_bn = cfg["cin"], cfg["cout"], cfg["bn"]
            p_sz = 1 << l                                # input phase planes per axis
            w_ref, b_ref = params[l][0], params[l][1]
            wmat = w_ref[...]
            bias_b = jnp.broadcast_to(b_ref[...], (4 * cout, ns))     # hoisted
            col_ok, row_ok = boundary_masks(cin)
            if l == 0:
                plane = lambda py, px: x_ref[...]
            else:
                plane = (lambda py, px, _b=prev_scratch, _p=p_sz:
                         _b[py * _p + px])
            out_buf = scratch[l] if l < n_layers - 1 else o_ref

            if has_bn:
                ssum = jnp.zeros((cout, ns), jnp.float32)
                ssq = jnp.zeros((cout, ns), jnp.float32)

            for py in range(p_sz):
                for px in range(p_sz):
                    x4 = jnp.concatenate(
                        [shifted(plane, p_sz, py, px, 0, 0, col_ok, row_ok),
                         shifted(plane, p_sz, py, px, 0, 1, col_ok, row_ok),
                         shifted(plane, p_sz, py, px, 1, 0, col_ok, row_ok),
                         shifted(plane, p_sz, py, px, 1, 1, col_ok, row_ok)],
                        axis=0)                                        # (4*Cin, N*S0)
                    r = jnp.dot(wmat, x4,
                                preferred_element_type=jnp.float32) + bias_b
                    if has_bn:
                        a = jnp.maximum(r, 0.0)                        # ReLU
                        # pass 1: pre-BN activations straight into VMEM scratch
                        for sy in range(2):
                            for sx in range(2):
                                g = 2 * sy + sx
                                out_buf[(2 * py + sy) * (2 * p_sz) + (2 * px + sx)] = \
                                    a[g * cout:(g + 1) * cout]
                        # per-channel batch stats via sublane-slice adds (no MXU fold)
                        ssum = ssum + (a[0:cout] + a[cout:2 * cout]
                                       + a[2 * cout:3 * cout] + a[3 * cout:4 * cout])
                        a2 = a * a
                        ssq = ssq + (a2[0:cout] + a2[cout:2 * cout]
                                     + a2[2 * cout:3 * cout] + a2[3 * cout:4 * cout])
                    else:
                        out_buf[py * p_sz + px] = jax.nn.sigmoid(r)

            if has_bn:
                g_ref, be_ref = params[l][2], params[l][3]
                inv_cnt = 1.0 / float(ns * (2 * p_sz) ** 2)            # N*H_out*W_out
                mean = jnp.sum(ssum, axis=1, keepdims=True) * inv_cnt
                var = jnp.sum(ssq, axis=1, keepdims=True) * inv_cnt - mean * mean
                var = jnp.maximum(var, 0.0)
                scale = g_ref[...] * lax.rsqrt(var + eps)              # (Cout, 1)
                shift = be_ref[...] - mean * scale
                scale_b = jnp.broadcast_to(scale, (cout, ns))          # hoisted
                shift_b = jnp.broadcast_to(shift, (cout, ns))
                # pass 2: normalize in place (VMEM-resident ref, tiny static trips)
                for p in range((2 * p_sz) ** 2):
                    out_buf[p] = out_buf[p] * scale_b + shift_b

            prev_scratch = out_buf

    return kernel


# ---------------------------------------------------------------------------
# Wrappers
# ---------------------------------------------------------------------------
def pack_conv_transpose_params(wt, bias):
    """Precompute the sub-pixel weight matrix (done once at parameter setup).

    wt: (Cin, Cout, 3, 3) PyTorch ConvTranspose2d weight, bias: (Cout,).
    Output phase (sy, sx) of ConvTranspose2d(k=3, s=2, p=1, op=1):
      O[0,0][a,b] = w[1,1]*x[a,b]
      O[0,1][a,b] = w[1,2]*x[a,b] + w[1,0]*x[a,b+1]
      O[1,0][a,b] = w[2,1]*x[a,b] + w[0,1]*x[a+1,b]
      O[1,1][a,b] = w[2,2]*x[a,b] + w[2,0]*x[a,b+1] + w[0,2]*x[a+1,b] + w[0,0]*x[a+1,b+1]
    Packed as (4*Cout, 4*Cin): rows phase-major, columns variant-major
    ([x, x(+b), x(+a), x(+a,+b)] blocks, matching the kernel's shift variants).
    """
    cin, cout = wt.shape[0], wt.shape[1]
    w = jnp.transpose(wt, (1, 0, 2, 3)).astype(jnp.float32)   # (Cout, Cin, ky, kx)
    z = jnp.zeros((cout, cin), jnp.float32)
    rows = [
        jnp.concatenate([w[:, :, 1, 1], z, z, z], axis=1),                              # (0,0)
        jnp.concatenate([w[:, :, 1, 2], w[:, :, 1, 0], z, z], axis=1),                  # (0,1)
        jnp.concatenate([w[:, :, 2, 1], z, w[:, :, 0, 1], z], axis=1),                  # (1,0)
        jnp.concatenate([w[:, :, 2, 2], w[:, :, 2, 0], w[:, :, 0, 2], w[:, :, 0, 0]],
                        axis=1),                                                        # (1,1)
    ]
    w_all = jnp.concatenate(rows, axis=0)                      # (4*Cout, 4*Cin)
    bias4 = jnp.tile(bias.astype(jnp.float32).reshape(1, cout), (4, 1)).reshape(4 * cout, 1)
    return w_all, bias4


def prepare_params(raw_params):
    """Pack all layer weights once (not re-done per forward call)."""
    layers = []
    n_layers = len(raw_params["convs"])
    for i, (wt, b) in enumerate(raw_params["convs"]):
        w_packed, bias4 = pack_conv_transpose_params(wt, b)
        layer = {"w": w_packed, "b": bias4}
        if i < n_layers - 1:
            gamma, beta = raw_params["bns"][i]
            layer["gamma"] = gamma
            layer["beta"] = beta
        layers.append(layer)
    return layers


def upconv_block_forward(x_nchw, layers, eps=1e-5):
    """Reproduces UpConvBlock.forward: (N, C0, H, W) -> (N, Cimg, H*2^L, W*2^L)."""
    n, c0, h0, w0 = x_nchw.shape
    s0 = h0 * w0
    ns = n * s0
    n_layers = len(layers)

    cfgs, args = [], []
    for i, lyr in enumerate(layers):
        cout4, cin4 = lyr["w"].shape
        cfg = {"cin": cin4 // 4, "cout": cout4 // 4, "bn": i < n_layers - 1}
        cfgs.append(cfg)
        args.extend([lyr["w"], lyr["b"]])
        if cfg["bn"]:
            args.extend([lyr["gamma"].reshape(-1, 1).astype(jnp.float32),
                         lyr["beta"].reshape(-1, 1).astype(jnp.float32)])

    # Pack the batch into the lane axis ONCE (lane-dense matmuls/stores in-kernel).
    x_packed = x_nchw.astype(jnp.float32).reshape(n, c0, s0).transpose(1, 0, 2).reshape(c0, ns)

    c_img = cfgs[-1]["cout"]
    p_last = 1 << (n_layers - 1)          # phase planes per axis at final layer input
    out_shape = jax.ShapeDtypeStruct((p_last * p_last, 4 * c_img, ns), jnp.float32)
    scratch = [pltpu.VMEM(((1 << (i + 1)) ** 2, cfgs[i]["cout"], ns), jnp.float32)
               for i in range(n_layers - 1)]

    # advisory cost estimate for XLA scheduling around the fused custom call
    flops = int(sum(2 * (4 * c["cout"]) * (4 * c["cin"]) * ns * (4 ** i)
                    for i, c in enumerate(cfgs)))
    out_elems = int(p_last * p_last * 4 * c_img * ns)
    bytes_accessed = int(4 * (c0 * ns + sum(int(a.size) for a in args) + out_elems))

    out = pl.pallas_call(
        _make_fused_kernel(cfgs, n, h0, w0, eps),
        out_shape=out_shape,
        scratch_shapes=scratch,
        cost_estimate=pl.CostEstimate(flops=flops,
                                      transcendentals=out_elems,
                                      bytes_accessed=bytes_accessed),
    )(x_packed, *args)

    # Single final unphase (the only output-side XLA transpose for the whole block):
    # plane = py_in*P + px_in, row = (2*sy+sx)*C + c, lane = n*S0 + a0*W0 + b0,
    # a' = a0*2^L + 2*py_in + sy, b' = b0*2^L + 2*px_in + sx.
    P = p_last
    y = out.reshape(P, P, 2, 2, c_img, n, h0, w0)
    y = jnp.transpose(y, (5, 4, 6, 0, 2, 7, 1, 3))
    return y.reshape(n, c_img, h0 * (2 ** n_layers), w0 * (2 ** n_layers))


# ---------------------------------------------------------------------------
# Pure-JAX reference (zero-dilation formulation) for validation
# ---------------------------------------------------------------------------
def _reference_forward(x, raw_params, eps=1e-5):
    hi = jax.lax.Precision.HIGHEST
    n_layers = len(raw_params["convs"])
    for i, (wt, b) in enumerate(raw_params["convs"]):
        nb, cin, h, w = x.shape
        cout = wt.shape[1]
        xd = jnp.zeros((nb, cin, 2 * h - 1, 2 * w - 1), x.dtype).at[:, :, ::2, ::2].set(x)
        xp = jnp.pad(xd, ((0, 0), (0, 0), (1, 2), (1, 2)))
        wk = jnp.flip(wt, axis=(2, 3))
        out = jnp.zeros((nb, cout, 2 * h, 2 * w), jnp.float32)
        for ky in range(3):
            for kx in range(3):
                win = xp[:, :, ky:ky + 2 * h, kx:kx + 2 * w]
                out = out + jnp.einsum("nchw,cd->ndhw", win, wk[:, :, ky, kx], precision=hi)
        out = out + b.reshape(1, cout, 1, 1)
        if i == n_layers - 1:
            x = jax.nn.sigmoid(out)
        else:
            out = jnp.maximum(out, 0.0)
            g, be = raw_params["bns"][i]
            mean = jnp.mean(out, axis=(0, 2, 3), keepdims=True)
            var = jnp.mean(jnp.square(out - mean), axis=(0, 2, 3), keepdims=True)
            x = ((out - mean) * jax.lax.rsqrt(var + eps) * g.reshape(1, cout, 1, 1)
                 + be.reshape(1, cout, 1, 1))
    return x


# ---------------------------------------------------------------------------
if __name__ == "__main__":
    key = jax.random.PRNGKey(0)

    # module config: img_dims=(3, 32, 32), hidden_layer_dim_list=[8, 8]
    img_dims = (3, 32, 32)
    hidden_layer_dim_list = [8, 8]
    layer_dims = hidden_layer_dim_list + [img_dims[0]]   # [8, 8, 3] -> 2 conv layers

    N, H0, W0 = 2, 8, 8                                  # 8x8 -> 16x16 -> 32x32

    # deterministic parameter init (PyTorch-style uniform bounds)
    raw = {"convs": [], "bns": []}
    keys = iter(jax.random.split(key, 4 * len(layer_dims)))
    for cin, cout in zip(layer_dims[:-1], layer_dims[1:]):
        bound = 1.0 / math.sqrt(cin * 3 * 3)
        wt = jax.random.uniform(next(keys), (cin, cout, 3, 3), jnp.float32, -bound, bound)
        bb = jax.random.uniform(next(keys), (cout,), jnp.float32, -bound, bound)
        raw["convs"].append((wt, bb))
        raw["bns"].append((jnp.ones((cout,), jnp.float32),
                           jnp.zeros((cout,), jnp.float32)))

    x = jax.random.normal(next(keys), (N, layer_dims[0], H0, W0), jnp.float32)

    layers = prepare_params(raw)                         # weight transform done once
    fwd = jax.jit(upconv_block_forward)
    out = jax.block_until_ready(fwd(x, layers))

    assert out.shape == (N, img_dims[0], img_dims[1], img_dims[2]), out.shape
    assert bool(jnp.all(jnp.isfinite(out)))
    assert bool(jnp.all((out >= 0.0) & (out <= 1.0)))    # final sigmoid range

    ref = _reference_forward(x, raw)
    max_err = float(jnp.max(jnp.abs(out - ref)))
    assert max_err < 1e-3, f"max abs err vs reference = {max_err}"

    print("KERNEL_OK")
</pallas_src>

<mosaic_0001>
module attributes {stable_mosaic.version = 11 : i64} {
  func.func @kernel(%arg0: memref<8x128xf32, #tpu.memory_space<vmem>>, %arg1: memref<32x32xf32, #tpu.memory_space<vmem>>, %arg2: memref<32x1xf32, #tpu.memory_space<vmem>>, %arg3: memref<8x1xf32, #tpu.memory_space<vmem>>, %arg4: memref<8x1xf32, #tpu.memory_space<vmem>>, %arg5: memref<12x32xf32, #tpu.memory_space<vmem>>, %arg6: memref<12x1xf32, #tpu.memory_space<vmem>>, %arg7: memref<4x12x128xf32, #tpu.memory_space<vmem>>, %arg8: memref<4x8x128xf32, #tpu.memory_space<vmem>>) attributes {dimension_semantics = [], scalar_prefetch = 0 : i64, scratch_operands = 1 : i64, tpu.core_type = #tpu.core_type<tc>} {
    %c0 = arith.constant 0 : index
    %c0_0 = arith.constant 0 : index
    %0 = vector.load %arg1[%c0, %c0_0] : memref<32x32xf32, #tpu.memory_space<vmem>>, vector<32x32xf32>
    %c0_1 = arith.constant 0 : index
    %c0_2 = arith.constant 0 : index
    %1 = vector.load %arg2[%c0_1, %c0_2] : memref<32x1xf32, #tpu.memory_space<vmem>>, vector<32x1xf32>
    %2 = vector.shape_cast %1 : vector<32x1xf32> to vector<32x1xf32>
    %3 = vector.broadcast %2 : vector<32x1xf32> to vector<32x128xf32>
    %4 = tpu.iota {dimensions = array<i32: 1>} : vector<8x128xi32>
    %c64_i32 = arith.constant 64 : i32
    %c0_i32 = arith.constant 0 : i32
    %5 = arith.cmpi eq, %c64_i32, %c0_i32 : i32
    %c1_i32 = arith.constant 1 : i32
    %6 = arith.select %5, %c1_i32, %c64_i32 : i32
    %7 = vector.broadcast %6 : i32 to vector<8x128xi32>
    %8 = arith.remsi %4, %7 : vector<8x128xi32>
    %c0_i32_3 = arith.constant 0 : i32
    %9 = vector.broadcast %c0_i32_3 : i32 to vector<8x128xi32>
    %10 = arith.cmpi ne, %8, %9 : vector<8x128xi32>
    %c0_i32_4 = arith.constant 0 : i32
    %11 = vector.broadcast %c0_i32_4 : i32 to vector<8x128xi32>
    %12 = arith.cmpi slt, %8, %11 : vector<8x128xi32>
    %c0_i32_5 = arith.constant 0 : i32
    %13 = arith.cmpi slt, %6, %c0_i32_5 : i32
    %14 = vector.broadcast %13 : i1 to vector<8x128xi1>
    %15 = vector.broadcast %14 : vector<8x128xi1> to vector<8x128xi1>
    %16 = arith.xori %12, %15 : vector<8x128xi1>
    %17 = arith.andi %16, %10 : vector<8x128xi1>
    %18 = vector.broadcast %6 : i32 to vector<8x128xi32>
    %19 = arith.addi %8, %18 : vector<8x128xi32>
    %20 = arith.select %17, %19, %8 : vector<8x128xi1>, vector<8x128xi32>
    %c8_i32 = arith.constant 8 : i32
    %c0_i32_6 = arith.constant 0 : i32
    %21 = arith.cmpi eq, %c8_i32, %c0_i32_6 : i32
    %c1_i32_7 = arith.constant 1 : i32
    %22 = arith.select %21, %c1_i32_7, %c8_i32 : i32
    %23 = vector.broadcast %22 : i32 to vector<8x128xi32>
    %24 = arith.remsi %20, %23 : vector<8x128xi32>
    %c0_i32_8 = arith.constant 0 : i32
    %25 = vector.broadcast %c0_i32_8 : i32 to vector<8x128xi32>
    %26 = arith.cmpi ne, %24, %25 : vector<8x128xi32>
    %c0_i32_9 = arith.constant 0 : i32
    %27 = vector.broadcast %c0_i32_9 : i32 to vector<8x128xi32>
    %28 = arith.cmpi slt, %24, %27 : vector<8x128xi32>
    %c0_i32_10 = arith.constant 0 : i32
    %29 = arith.cmpi slt, %22, %c0_i32_10 : i32
    %30 = vector.broadcast %29 : i1 to vector<8x128xi1>
    %31 = vector.broadcast %30 : vector<8x128xi1> to vector<8x128xi1>
    %32 = arith.xori %28, %31 : vector<8x128xi1>
    %33 = arith.andi %32, %26 : vector<8x128xi1>
    %34 = vector.broadcast %22 : i32 to vector<8x128xi32>
    %35 = arith.addi %24, %34 : vector<8x128xi32>
    %36 = arith.select %33, %35, %24 : vector<8x128xi1>, vector<8x128xi32>
    %c7_i32 = arith.constant 7 : i32
    %37 = vector.broadcast %c7_i32 : i32 to vector<8x128xi32>
    %38 = arith.cmpi ne, %36, %37 : vector<8x128xi32>
    %c56_i32 = arith.constant 56 : i32
    %39 = vector.broadcast %c56_i32 : i32 to vector<8x128xi32>
    %40 = arith.cmpi slt, %20, %39 : vector<8x128xi32>
    %cst = arith.constant 0.000000e+00 : f32
    %41 = vector.broadcast %cst : f32 to vector<8x128xf32>
    %cst_11 = arith.constant 0.000000e+00 : f32
    %42 = vector.broadcast %cst_11 : f32 to vector<8x128xf32>
    %c0_12 = arith.constant 0 : index
    %c0_13 = arith.constant 0 : index
    %43 = vector.load %arg0[%c0_12, %c0_13] : memref<8x128xf32, #tpu.memory_space<vmem>>, vector<8x128xf32>
    %c0_14 = arith.constant 0 : index
    %c0_15 = arith.constant 0 : index
    %44 = vector.load %arg0[%c0_14, %c0_15] : memref<8x128xf32, #tpu.memory_space<vmem>>, vector<8x128xf32>
    %c127_i32 = arith.constant 127 : i32
    %45 = tpu.dynamic_rotate %44 by %c127_i32 dim 1 : vector<8x128xf32>, i32 -> vector<8x128xf32>
    %cst_16 = arith.constant 0.000000e+00 : f32
    %46 = vector.broadcast %cst_16 : f32 to vector<8x128xf32>
    %47 = arith.select %38, %45, %46 : vector<8x128xi1>, vector<8x128xf32>
    %c0_17 = arith.constant 0 : index
    %c0_18 = arith.constant 0 : index
    %48 = vector.load %arg0[%c0_17, %c0_18] : memref<8x128xf32, #tpu.memory_space<vmem>>, vector<8x128xf32>
    %c120_i32 = arith.constant 120 : i32
    %49 = tpu.dynamic_rotate %48 by %c120_i32 dim 1 : vector<8x128xf32>, i32 -> vector<8x128xf32>
    %cst_19 = arith.constant 0.000000e+00 : f32
    %50 = vector.broadcast %cst_19 : f32 to vector<8x128xf32>
    %51 = arith.select %40, %49, %50 : vector<8x128xi1>, vector<8x128xf32>
    %c0_20 = arith.constant 0 : index
    %c0_21 = arith.constant 0 : index
    %52 = vector.load %arg0[%c0_20, %c0_21] : memref<8x128xf32, #tpu.memory_space<vmem>>, vector<8x128xf32>
    %c119_i32 = arith.constant 119 : i32
    %53 = tpu.dynamic_rotate %52 by %c119_i32 dim 1 : vector<8x128xf32>, i32 -> vector<8x128xf32>
    %54 = arith.andi %40, %38 : vector<8x128xi1>
    %cst_22 = arith.constant 0.000000e+00 : f32
    %55 = vector.broadcast %cst_22 : f32 to vector<8x128xf32>
    %56 = arith.select %54, %53, %55 : vector<8x128xi1>, vector<8x128xf32>
    %57 = tpu.concatenate %43, %47, %51, %56 in 0 : vector<8x128xf32>, vector<8x128xf32>, vector<8x128xf32>, vector<8x128xf32> -> vector<32x128xf32>
    %cst_23 = arith.constant dense<0.000000e+00> : vector<32x128xf32>
    %58 = tpu.matmul %0, %57, %cst_23 {dimension_numbers = #tpu.dot_dimension_numbers<[1], [0], [0], [1], [0, 0, 1, 1], [], []>} : vector<32x32xf32>, vector<32x128xf32>, vector<32x128xf32> -> vector<32x128xf32>
    %59 = arith.addf %58, %3 : vector<32x128xf32>
    %cst_24 = arith.constant 0.000000e+00 : f32
    %60 = vector.broadcast %cst_24 : f32 to vector<32x128xf32>
    %61 = arith.maximumf %59, %60 : vector<32x128xf32>
    %62 = vector.extract_strided_slice %61 {offsets = [0, 0], sizes = [8, 128], strides = [1, 1]} : vector<32x128xf32> to vector<8x128xf32>
    %c0_25 = arith.constant 0 : index
    %c0_26 = arith.constant 0 : index
    %c0_27 = arith.constant 0 : index
    %63 = vector.load %arg8[%c0_25, %c0_26, %c0_27] : memref<4x8x128xf32, #tpu.memory_space<vmem>>, vector<1x8x128xf32>
    %64 = vector.shape_cast %63 : vector<1x8x128xf32> to vector<8x128xf32>
    %65 = vector.shape_cast %62 : vector<8x128xf32> to vector<1x8x128xf32>
    tpu.vector_store %arg8[%c0_25, %c0_26, %c0_27], %65 {strides = array<i32>} : memref<4x8x128xf32, #tpu.memory_space<vmem>>, vector<1x8x128xf32>,
    %66 = vector.extract_strided_slice %61 {offsets = [8, 0], sizes = [8, 128], strides = [1, 1]} : vector<32x128xf32> to vector<8x128xf32>
    %c1 = arith.constant 1 : index
    %c0_28 = arith.constant 0 : index
    %c0_29 = arith.constant 0 : index
    %67 = vector.load %arg8[%c1, %c0_28, %c0_29] : memref<4x8x128xf32, #tpu.memory_space<vmem>>, vector<1x8x128xf32>
    %68 = vector.shape_cast %67 : vector<1x8x128xf32> to vector<8x128xf32>
    %69 = vector.shape_cast %66 : vector<8x128xf32> to vector<1x8x128xf32>
    tpu.vector_store %arg8[%c1, %c0_28, %c0_29], %69 {strides = array<i32>} : memref<4x8x128xf32, #tpu.memory_space<vmem>>, vector<1x8x128xf32>,
    %70 = vector.extract_strided_slice %61 {offsets = [16, 0], sizes = [8, 128], strides = [1, 1]} : vector<32x128xf32> to vector<8x128xf32>
    %c2 = arith.constant 2 : index
    %c0_30 = arith.constant 0 : index
    %c0_31 = arith.constant 0 : index
    %71 = vector.load %arg8[%c2, %c0_30, %c0_31] : memref<4x8x128xf32, #tpu.memory_space<vmem>>, vector<1x8x128xf32>
    %72 = vector.shape_cast %71 : vector<1x8x128xf32> to vector<8x128xf32>
    %73 = vector.shape_cast %70 : vector<8x128xf32> to vector<1x8x128xf32>
    tpu.vector_store %arg8[%c2, %c0_30, %c0_31], %73 {strides = array<i32>} : memref<4x8x128xf32, #tpu.memory_space<vmem>>, vector<1x8x128xf32>,
    %74 = vector.extract_strided_slice %61 {offsets = [24, 0], sizes = [8, 128], strides = [1, 1]} : vector<32x128xf32> to vector<8x128xf32>
    %c3 = arith.constant 3 : index
    %c0_32 = arith.constant 0 : index
    %c0_33 = arith.constant 0 : index
    %75 = vector.load %arg8[%c3, %c0_32, %c0_33] : memref<4x8x128xf32, #tpu.memory_space<vmem>>, vector<1x8x128xf32>
    %76 = vector.shape_cast %75 : vector<1x8x128xf32> to vector<8x128xf32>
    %77 = vector.shape_cast %74 : vector<8x128xf32> to vector<1x8x128xf32>
    tpu.vector_store %arg8[%c3, %c0_32, %c0_33], %77 {strides = array<i32>} : memref<4x8x128xf32, #tpu.memory_space<vmem>>, vector<1x8x128xf32>,
    %78 = vector.extract_strided_slice %61 {offsets = [0, 0], sizes = [8, 128], strides = [1, 1]} : vector<32x128xf32> to vector<8x128xf32>
    %79 = vector.extract_strided_slice %61 {offsets = [8, 0], sizes = [8, 128], strides = [1, 1]} : vector<32x128xf32> to vector<8x128xf32>
    %80 = arith.addf %78, %79 : vector<8x128xf32>
    %81 = vector.extract_strided_slice %61 {offsets = [16, 0], sizes = [8, 128], strides = [1, 1]} : vector<32x128xf32> to vector<8x128xf32>
    %82 = arith.addf %80, %81 : vector<8x128xf32>
    %83 = vector.extract_strided_slice %61 {offsets = [24, 0], sizes = [8, 128], strides = [1, 1]} : vector<32x128xf32> to vector<8x128xf32>
    %84 = arith.addf %82, %83 : vector<8x128xf32>
    %85 = arith.addf %41, %84 : vector<8x128xf32>
    %86 = arith.mulf %61, %61 : vector<32x128xf32>
    %87 = vector.extract_strided_slice %86 {offsets = [0, 0], sizes = [8, 128], strides = [1, 1]} : vector<32x128xf32> to vector<8x128xf32>
    %88 = vector.extract_strided_slice %86 {offsets = [8, 0], sizes = [8, 128], strides = [1, 1]} : vector<32x128xf32> to vector<8x128xf32>
    %89 = arith.addf %87, %88 : vector<8x128xf32>
    %90 = vector.extract_strided_slice %86 {offsets = [16, 0], sizes = [8, 128], strides = [1, 1]} : vector<32x128xf32> to vector<8x128xf32>
    %91 = arith.addf %89, %90 : vector<8x128xf32>
    %92 = vector.extract_strided_slice %86 {offsets = [24, 0], sizes = [8, 128], strides = [1, 1]} : vector<32x128xf32> to vector<8x128xf32>
    %93 = arith.addf %91, %92 : vector<8x128xf32>
    %94 = arith.addf %42, %93 : vector<8x128xf32>
    %cst_34 = arith.constant dense<0.000000e+00> : vector<8xf32>
    %95 = vector.multi_reduction <add>, %85, %cst_34 [1] : vector<8x128xf32> to vector<8xf32>
    %96 = vector.shape_cast %95 : vector<8xf32> to vector<8x1xf32>
    %cst_35 = arith.constant 0.001953125 : f32
    %97 = vector.broadcast %cst_35 : f32 to vector<8x1xf32>
    %98 = arith.mulf %96, %97 : vector<8x1xf32>
    %cst_36 = arith.constant dense<0.000000e+00> : vector<8xf32>
    %99 = vector.multi_reduction <add>, %94, %cst_36 [1] : vector<8x128xf32> to vector<8xf32>
    %100 = vector.shape_cast %99 : vector<8xf32> to vector<8x1xf32>
    %cst_37 = arith.constant 0.001953125 : f32
    %101 = vector.broadcast %cst_37 : f32 to vector<8x1xf32>
    %102 = arith.mulf %100, %101 : vector<8x1xf32>
    %103 = arith.mulf %98, %98 : vector<8x1xf32>
    %104 = arith.subf %102, %103 : vector<8x1xf32>
    %cst_38 = arith.constant 0.000000e+00 : f32
    %105 = vector.broadcast %cst_38 : f32 to vector<8x1xf32>
    %106 = arith.maximumf %104, %105 : vector<8x1xf32>
    %c0_39 = arith.constant 0 : index
    %c0_40 = arith.constant 0 : index
    %107 = vector.load %arg3[%c0_39, %c0_40] : memref<8x1xf32, #tpu.memory_space<vmem>>, vector<8x1xf32>
    %cst_41 = arith.constant 9.99999974E-6 : f32
    %108 = vector.broadcast %cst_41 : f32 to vector<8x1xf32>
    %109 = arith.addf %106, %108 : vector<8x1xf32>
    %110 = math.rsqrt %109 : vector<8x1xf32>
    %111 = arith.mulf %107, %110 : vector<8x1xf32>
    %c0_42 = arith.constant 0 : index
    %c0_43 = arith.constant 0 : index
    %112 = vector.load %arg4[%c0_42, %c0_43] : memref<8x1xf32, #tpu.memory_space<vmem>>, vector<8x1xf32>
    %113 = arith.mulf %98, %111 : vector<8x1xf32>
    %114 = arith.subf %112, %113 : vector<8x1xf32>
    %115 = vector.shape_cast %111 : vector<8x1xf32> to vector<8x1xf32>
    %116 = vector.broadcast %115 : vector<8x1xf32> to vector<8x128xf32>
    %117 = vector.shape_cast %114 : vector<8x1xf32> to vector<8x1xf32>
    %118 = vector.broadcast %117 : vector<8x1xf32> to vector<8x128xf32>
    %c0_44 = arith.constant 0 : index
    %c0_45 = arith.constant 0 : index
    %c0_46 = arith.constant 0 : index
    %119 = vector.load %arg8[%c0_44, %c0_45, %c0_46] : memref<4x8x128xf32, #tpu.memory_space<vmem>>, vector<1x8x128xf32>
    %120 = vector.shape_cast %119 : vector<1x8x128xf32> to vector<8x128xf32>
    %121 = arith.mulf %120, %116 : vector<8x128xf32>
    %122 = arith.addf %121, %118 : vector<8x128xf32>
    %c0_47 = arith.constant 0 : index
    %c0_48 = arith.constant 0 : index
    %c0_49 = arith.constant 0 : index
    %123 = vector.load %arg8[%c0_47, %c0_48, %c0_49] : memref<4x8x128xf32, #tpu.memory_space<vmem>>, vector<1x8x128xf32>
    %124 = vector.shape_cast %123 : vector<1x8x128xf32> to vector<8x128xf32>
    %125 = vector.shape_cast %122 : vector<8x128xf32> to vector<1x8x128xf32>
    tpu.vector_store %arg8[%c0_47, %c0_48, %c0_49], %125 {strides = array<i32>} : memref<4x8x128xf32, #tpu.memory_space<vmem>>, vector<1x8x128xf32>,
    %c1_50 = arith.constant 1 : index
    %c0_51 = arith.constant 0 : index
    %c0_52 = arith.constant 0 : index
    %126 = vector.load %arg8[%c1_50, %c0_51, %c0_52] : memref<4x8x128xf32, #tpu.memory_space<vmem>>, vector<1x8x128xf32>
    %127 = vector.shape_cast %126 : vector<1x8x128xf32> to vector<8x128xf32>
    %128 = arith.mulf %127, %116 : vector<8x128xf32>
    %129 = arith.addf %128, %118 : vector<8x128xf32>
    %c1_53 = arith.constant 1 : index
    %c0_54 = arith.constant 0 : index
    %c0_55 = arith.constant 0 : index
    %130 = vector.load %arg8[%c1_53, %c0_54, %c0_55] : memref<4x8x128xf32, #tpu.memory_space<vmem>>, vector<1x8x128xf32>
    %131 = vector.shape_cast %130 : vector<1x8x128xf32> to vector<8x128xf32>
    %132 = vector.shape_cast %129 : vector<8x128xf32> to vector<1x8x128xf32>
    tpu.vector_store %arg8[%c1_53, %c0_54, %c0_55], %132 {strides = array<i32>} : memref<4x8x128xf32, #tpu.memory_space<vmem>>, vector<1x8x128xf32>,
    %c2_56 = arith.constant 2 : index
    %c0_57 = arith.constant 0 : index
    %c0_58 = arith.constant 0 : index
    %133 = vector.load %arg8[%c2_56, %c0_57, %c0_58] : memref<4x8x128xf32, #tpu.memory_space<vmem>>, vector<1x8x128xf32>
    %134 = vector.shape_cast %133 : vector<1x8x128xf32> to vector<8x128xf32>
    %135 = arith.mulf %134, %116 : vector<8x128xf32>
    %136 = arith.addf %135, %118 : vector<8x128xf32>
    %c2_59 = arith.constant 2 : index
    %c0_60 = arith.constant 0 : index
    %c0_61 = arith.constant 0 : index
    %137 = vector.load %arg8[%c2_59, %c0_60, %c0_61] : memref<4x8x128xf32, #tpu.memory_space<vmem>>, vector<1x8x128xf32>
    %138 = vector.shape_cast %137 : vector<1x8x128xf32> to vector<8x128xf32>
    %139 = vector.shape_cast %136 : vector<8x128xf32> to vector<1x8x128xf32>
    tpu.vector_store %arg8[%c2_59, %c0_60, %c0_61], %139 {strides = array<i32>} : memref<4x8x128xf32, #tpu.memory_space<vmem>>, vector<1x8x128xf32>,
    %c3_62 = arith.constant 3 : index
    %c0_63 = arith.constant 0 : index
    %c0_64 = arith.constant 0 : index
    %140 = vector.load %arg8[%c3_62, %c0_63, %c0_64] : memref<4x8x128xf32, #tpu.memory_space<vmem>>, vector<1x8x128xf32>
    %141 = vector.shape_cast %140 : vector<1x8x128xf32> to vector<8x128xf32>
    %142 = arith.mulf %141, %116 : vector<8x128xf32>
    %143 = arith.addf %142, %118 : vector<8x128xf32>
    %c3_65 = arith.constant 3 : index
    %c0_66 = arith.constant 0 : index
    %c0_67 = arith.constant 0 : index
    %144 = vector.load %arg8[%c3_65, %c0_66, %c0_67] : memref<4x8x128xf32, #tpu.memory_space<vmem>>, vector<1x8x128xf32>
    %145 = vector.shape_cast %144 : vector<1x8x128xf32> to vector<8x128xf32>
    %146 = vector.shape_cast %143 : vector<8x128xf32> to vector<1x8x128xf32>
    tpu.vector_store %arg8[%c3_65, %c0_66, %c0_67], %146 {strides = array<i32>} : memref<4x8x128xf32, #tpu.memory_space<vmem>>, vector<1x8x128xf32>,
    %c0_68 = arith.constant 0 : index
    %c0_69 = arith.constant 0 : index
    %147 = vector.load %arg5[%c0_68, %c0_69] : memref<12x32xf32, #tpu.memory_space<vmem>>, vector<12x32xf32>
    %c0_70 = arith.constant 0 : index
    %c0_71 = arith.constant 0 : index
    %148 = vector.load %arg6[%c0_70, %c0_71] : memref<12x1xf32, #tpu.memory_space<vmem>>, vector<12x1xf32>
    %149 = vector.shape_cast %148 : vector<12x1xf32> to vector<12x1xf32>
    %150 = vector.broadcast %149 : vector<12x1xf32> to vector<12x128xf32>
    %151 = tpu.iota {dimensions = array<i32: 1>} : vector<8x128xi32>
    %c64_i32_72 = arith.constant 64 : i32
    %c0_i32_73 = arith.constant 0 : i32
    %152 = arith.cmpi eq, %c64_i32_72, %c0_i32_73 : i32
    %c1_i32_74 = arith.constant 1 : i32
    %153 = arith.select %152, %c1_i32_74, %c64_i32_72 : i32
    %154 = vector.broadcast %153 : i32 to vector<8x128xi32>
    %155 = arith.remsi %151, %154 : vector<8x128xi32>
    %c0_i32_75 = arith.constant 0 : i32
    %156 = vector.broadcast %c0_i32_75 : i32 to vector<8x128xi32>
    %157 = arith.cmpi ne, %155, %156 : vector<8x128xi32>
    %c0_i32_76 = arith.constant 0 : i32
    %158 = vector.broadcast %c0_i32_76 : i32 to vector<8x128xi32>
    %159 = arith.cmpi slt, %155, %158 : vector<8x128xi32>
    %c0_i32_77 = arith.constant 0 : i32
    %160 = arith.cmpi slt, %153, %c0_i32_77 : i32
    %161 = vector.broadcast %160 : i1 to vector<8x128xi1>
    %162 = vector.broadcast %161 : vector<8x128xi1> to vector<8x128xi1>
    %163 = arith.xori %159, %162 : vector<8x128xi1>
    %164 = arith.andi %163, %157 : vector<8x128xi1>
    %165 = vector.broadcast %153 : i32 to vector<8x128xi32>
    %166 = arith.addi %155, %165 : vector<8x128xi32>
    %167 = arith.select %164, %166, %155 : vector<8x128xi1>, vector<8x128xi32>
    %c8_i32_78 = arith.constant 8 : i32
    %c0_i32_79 = arith.constant 0 : i32
    %168 = arith.cmpi eq, %c8_i32_78, %c0_i32_79 : i32
    %c1_i32_80 = arith.constant 1 : i32
    %169 = arith.select %168, %c1_i32_80, %c8_i32_78 : i32
    %170 = vector.broadcast %169 : i32 to vector<8x128xi32>
    %171 = arith.remsi %167, %170 : vector<8x128xi32>
    %c0_i32_81 = arith.constant 0 : i32
    %172 = vector.broadcast %c0_i32_81 : i32 to vector<8x128xi32>
    %173 = arith.cmpi ne, %171, %172 : vector<8x128xi32>
    %c0_i32_82 = arith.constant 0 : i32
    %174 = vector.broadcast %c0_i32_82 : i32 to vector<8x128xi32>
    %175 = arith.cmpi slt, %171, %174 : vector<8x128xi32>
    %c0_i32_83 = arith.constant 0 : i32
    %176 = arith.cmpi slt, %169, %c0_i32_83 : i32
    %177 = vector.broadcast %176 : i1 to vector<8x128xi1>
    %178 = vector.broadcast %177 : vector<8x128xi1> to vector<8x128xi1>
    %179 = arith.xori %175, %178 : vector<8x128xi1>
    %180 = arith.andi %179, %173 : vector<8x128xi1>
    %181 = vector.broadcast %169 : i32 to vector<8x128xi32>
    %182 = arith.addi %171, %181 : vector<8x128xi32>
    %183 = arith.select %180, %182, %171 : vector<8x128xi1>, vector<8x128xi32>
    %c7_i32_84 = arith.constant 7 : i32
    %184 = vector.broadcast %c7_i32_84 : i32 to vector<8x128xi32>
    %185 = arith.cmpi ne, %183, %184 : vector<8x128xi32>
    %c56_i32_85 = arith.constant 56 : i32
    %186 = vector.broadcast %c56_i32_85 : i32 to vector<8x128xi32>
    %187 = arith.cmpi slt, %167, %186 : vector<8x128xi32>
    %c0_86 = arith.constant 0 : index
    %c0_87 = arith.constant 0 : index
    %c0_88 = arith.constant 0 : index
    %188 = vector.load %arg8[%c0_86, %c0_87, %c0_88] : memref<4x8x128xf32, #tpu.memory_space<vmem>>, vector<1x8x128xf32>
    %189 = vector.shape_cast %188 : vector<1x8x128xf32> to vector<8x128xf32>
    %c1_89 = arith.constant 1 : index
    %c0_90 = arith.constant 0 : index
    %c0_91 = arith.constant 0 : index
    %190 = vector.load %arg8[%c1_89, %c0_90, %c0_91] : memref<4x8x128xf32, #tpu.memory_space<vmem>>, vector<1x8x128xf32>
    %191 = vector.shape_cast %190 : vector<1x8x128xf32> to vector<8x128xf32>
    %c2_92 = arith.constant 2 : index
    %c0_93 = arith.constant 0 : index
    %c0_94 = arith.constant 0 : index
    %192 = vector.load %arg8[%c2_92, %c0_93, %c0_94] : memref<4x8x128xf32, #tpu.memory_space<vmem>>, vector<1x8x128xf32>
    %193 = vector.shape_cast %192 : vector<1x8x128xf32> to vector<8x128xf32>
    %c3_95 = arith.constant 3 : index
    %c0_96 = arith.constant 0 : index
    %c0_97 = arith.constant 0 : index
    %194 = vector.load %arg8[%c3_95, %c0_96, %c0_97] : memref<4x8x128xf32, #tpu.memory_space<vmem>>, vector<1x8x128xf32>
    %195 = vector.shape_cast %194 : vector<1x8x128xf32> to vector<8x128xf32>
    %196 = tpu.concatenate %189, %191, %193, %195 in 0 : vector<8x128xf32>, vector<8x128xf32>, vector<8x128xf32>, vector<8x128xf32> -> vector<32x128xf32>
    %cst_98 = arith.constant dense<0.000000e+00> : vector<12x128xf32>
    %197 = tpu.matmul %147, %196, %cst_98 {dimension_numbers = #tpu.dot_dimension_numbers<[1], [0], [0], [1], [0, 0, 1, 1], [], []>} : vector<12x32xf32>, vector<32x128xf32>, vector<12x128xf32> -> vector<12x128xf32>
    %198 = arith.addf %197, %150 : vector<12x128xf32>
    %199 = arith.negf %198 : vector<12x128xf32>
    %200 = math.exp %199 : vector<12x128xf32>
    %cst_99 = arith.constant 1.000000e+00 : f32
    %201 = vector.broadcast %cst_99 : f32 to vector<12x128xf32>
    %202 = arith.addf %201, %200 : vector<12x128xf32>
    %203 = arith.divf %201, %202 : vector<12x128xf32>
    %c0_100 = arith.constant 0 : index
    %c0_101 = arith.constant 0 : index
    %c0_102 = arith.constant 0 : index
    %204 = vector.load %arg7[%c0_100, %c0_101, %c0_102] : memref<4x12x128xf32, #tpu.memory_space<vmem>>, vector<1x12x128xf32>
    %205 = vector.shape_cast %204 : vector<1x12x128xf32> to vector<12x128xf32>
    %206 = vector.shape_cast %203 : vector<12x128xf32> to vector<1x12x128xf32>
    tpu.vector_store %arg7[%c0_100, %c0_101, %c0_102], %206 {strides = array<i32>} : memref<4x12x128xf32, #tpu.memory_space<vmem>>, vector<1x12x128xf32>,
    %c1_103 = arith.constant 1 : index
    %c0_104 = arith.constant 0 : index
    %c0_105 = arith.constant 0 : index
    %207 = vector.load %arg8[%c1_103, %c0_104, %c0_105] : memref<4x8x128xf32, #tpu.memory_space<vmem>>, vector<1x8x128xf32>
    %208 = vector.shape_cast %207 : vector<1x8x128xf32> to vector<8x128xf32>
    %c0_106 = arith.constant 0 : index
    %c0_107 = arith.constant 0 : index
    %c0_108 = arith.constant 0 : index
    %209 = vector.load %arg8[%c0_106, %c0_107, %c0_108] : memref<4x8x128xf32, #tpu.memory_space<vmem>>, vector<1x8x128xf32>
    %210 = vector.shape_cast %209 : vector<1x8x128xf32> to vector<8x128xf32>
    %c127_i32_109 = arith.constant 127 : i32
    %211 = tpu.dynamic_rotate %210 by %c127_i32_109 dim 1 : vector<8x128xf32>, i32 -> vector<8x128xf32>
    %cst_110 = arith.constant 0.000000e+00 : f32
    %212 = vector.broadcast %cst_110 : f32 to vector<8x128xf32>
    %213 = arith.select %185, %211, %212 : vector<8x128xi1>, vector<8x128xf32>
    %c3_111 = arith.constant 3 : index
    %c0_112 = arith.constant 0 : index
    %c0_113 = arith.constant 0 : index
    %214 = vector.load %arg8[%c3_111, %c0_112, %c0_113] : memref<4x8x128xf32, #tpu.memory_space<vmem>>, vector<1x8x128xf32>
    %215 = vector.shape_cast %214 : vector<1x8x128xf32> to vector<8x128xf32>
    %c2_114 = arith.constant 2 : index
    %c0_115 = arith.constant 0 : index
    %c0_116 = arith.constant 0 : index
    %216 = vector.load %arg8[%c2_114, %c0_115, %c0_116] : memref<4x8x128xf32, #tpu.memory_space<vmem>>, vector<1x8x128xf32>
    %217 = vector.shape_cast %216 : vector<1x8x128xf32> to vector<8x128xf32>
    %c127_i32_117 = arith.constant 127 : i32
    %218 = tpu.dynamic_rotate %217 by %c127_i32_117 dim 1 : vector<8x128xf32>, i32 -> vector<8x128xf32>
    %cst_118 = arith.constant 0.000000e+00 : f32
    %219 = vector.broadcast %cst_118 : f32 to vector<8x128xf32>
    %220 = arith.select %185, %218, %219 : vector<8x128xi1>, vector<8x128xf32>
    %221 = tpu.concatenate %208, %213, %215, %220 in 0 : vector<8x128xf32>, vector<8x128xf32>, vector<8x128xf32>, vector<8x128xf32> -> vector<32x128xf32>
    %cst_119 = arith.constant dense<0.000000e+00> : vector<12x128xf32>
    %222 = tpu.matmul %147, %221, %cst_119 {dimension_numbers = #tpu.dot_dimension_numbers<[1], [0], [0], [1], [0, 0, 1, 1], [], []>} : vector<12x32xf32>, vector<32x128xf32>, vector<12x128xf32> -> vector<12x128xf32>
    %223 = arith.addf %222, %150 : vector<12x128xf32>
    %224 = arith.negf %223 : vector<12x128xf32>
    %225 = math.exp %224 : vector<12x128xf32>
    %cst_120 = arith.constant 1.000000e+00 : f32
    %226 = vector.broadcast %cst_120 : f32 to vector<12x128xf32>
    %227 = arith.addf %226, %225 : vector<12x128xf32>
    %228 = arith.divf %226, %227 : vector<12x128xf32>
    %c1_121 = arith.constant 1 : index
    %c0_122 = arith.constant 0 : index
    %c0_123 = arith.constant 0 : index
    %229 = vector.load %arg7[%c1_121, %c0_122, %c0_123] : memref<4x12x128xf32, #tpu.memory_space<vmem>>, vector<1x12x128xf32>
    %230 = vector.shape_cast %229 : vector<1x12x128xf32> to vector<12x128xf32>
    %231 = vector.shape_cast %228 : vector<12x128xf32> to vector<1x12x128xf32>
    tpu.vector_store %arg7[%c1_121, %c0_122, %c0_123], %231 {strides = array<i32>} : memref<4x12x128xf32, #tpu.memory_space<vmem>>, vector<1x12x128xf32>,
    %c2_124 = arith.constant 2 : index
    %c0_125 = arith.constant 0 : index
    %c0_126 = arith.constant 0 : index
    %232 = vector.load %arg8[%c2_124, %c0_125, %c0_126] : memref<4x8x128xf32, #tpu.memory_space<vmem>>, vector<1x8x128xf32>
    %233 = vector.shape_cast %232 : vector<1x8x128xf32> to vector<8x128xf32>
    %c3_127 = arith.constant 3 : index
    %c0_128 = arith.constant 0 : index
    %c0_129 = arith.constant 0 : index
    %234 = vector.load %arg8[%c3_127, %c0_128, %c0_129] : memref<4x8x128xf32, #tpu.memory_space<vmem>>, vector<1x8x128xf32>
    %235 = vector.shape_cast %234 : vector<1x8x128xf32> to vector<8x128xf32>
    %c0_130 = arith.constant 0 : index
    %c0_131 = arith.constant 0 : index
    %c0_132 = arith.constant 0 : index
    %236 = vector.load %arg8[%c0_130, %c0_131, %c0_132] : memref<4x8x128xf32, #tpu.memory_space<vmem>>, vector<1x8x128xf32>
    %237 = vector.shape_cast %236 : vector<1x8x128xf32> to vector<8x128xf32>
    %c120_i32_133 = arith.constant 120 : i32
    %238 = tpu.dynamic_rotate %237 by %c120_i32_133 dim 1 : vector<8x128xf32>, i32 -> vector<8x128xf32>
    %cst_134 = arith.constant 0.000000e+00 : f32
    %239 = vector.broadcast %cst_134 : f32 to vector<8x128xf32>
    %240 = arith.select %187, %238, %239 : vector<8x128xi1>, vector<8x128xf32>
    %c1_135 = arith.constant 1 : index
    %c0_136 = arith.constant 0 : index
    %c0_137 = arith.constant 0 : index
    %241 = vector.load %arg8[%c1_135, %c0_136, %c0_137] : memref<4x8x128xf32, #tpu.memory_space<vmem>>, vector<1x8x128xf32>
    %242 = vector.shape_cast %241 : vector<1x8x128xf32> to vector<8x128xf32>
    %c120_i32_138 = arith.constant 120 : i32
    %243 = tpu.dynamic_rotate %242 by %c120_i32_138 dim 1 : vector<8x128xf32>, i32 -> vector<8x128xf32>
    %cst_139 = arith.constant 0.000000e+00 : f32
    %244 = vector.broadcast %cst_139 : f32 to vector<8x128xf32>
    %245 = arith.select %187, %243, %244 : vector<8x128xi1>, vector<8x128xf32>
    %246 = tpu.concatenate %233, %235, %240, %245 in 0 : vector<8x128xf32>, vector<8x128xf32>, vector<8x128xf32>, vector<8x128xf32> -> vector<32x128xf32>
    %cst_140 = arith.constant dense<0.000000e+00> : vector<12x128xf32>
    %247 = tpu.matmul %147, %246, %cst_140 {dimension_numbers = #tpu.dot_dimension_numbers<[1], [0], [0], [1], [0, 0, 1, 1], [], []>} : vector<12x32xf32>, vector<32x128xf32>, vector<12x128xf32> -> vector<12x128xf32>
    %248 = arith.addf %247, %150 : vector<12x128xf32>
    %249 = arith.negf %248 : vector<12x128xf32>
    %250 = math.exp %249 : vector<12x128xf32>
    %cst_141 = arith.constant 1.000000e+00 : f32
    %251 = vector.broadcast %cst_141 : f32 to vector<12x128xf32>
    %252 = arith.addf %251, %250 : vector<12x128xf32>
    %253 = arith.divf %251, %252 : vector<12x128xf32>
    %c2_142 = arith.constant 2 : index
    %c0_143 = arith.constant 0 : index
    %c0_144 = arith.constant 0 : index
    %254 = vector.load %arg7[%c2_142, %c0_143, %c0_144] : memref<4x12x128xf32, #tpu.memory_space<vmem>>, vector<1x12x128xf32>
    %255 = vector.shape_cast %254 : vector<1x12x128xf32> to vector<12x128xf32>
    %256 = vector.shape_cast %253 : vector<12x128xf32> to vector<1x12x128xf32>
    tpu.vector_store %arg7[%c2_142, %c0_143, %c0_144], %256 {strides = array<i32>} : memref<4x12x128xf32, #tpu.memory_space<vmem>>, vector<1x12x128xf32>,
    %c3_145 = arith.constant 3 : index
    %c0_146 = arith.constant 0 : index
    %c0_147 = arith.constant 0 : index
    %257 = vector.load %arg8[%c3_145, %c0_146, %c0_147] : memref<4x8x128xf32, #tpu.memory_space<vmem>>, vector<1x8x128xf32>
    %258 = vector.shape_cast %257 : vector<1x8x128xf32> to vector<8x128xf32>
    %c2_148 = arith.constant 2 : index
    %c0_149 = arith.constant 0 : index
    %c0_150 = arith.constant 0 : index
    %259 = vector.load %arg8[%c2_148, %c0_149, %c0_150] : memref<4x8x128xf32, #tpu.memory_space<vmem>>, vector<1x8x128xf32>
    %260 = vector.shape_cast %259 : vector<1x8x128xf32> to vector<8x128xf32>
    %c127_i32_151 = arith.constant 127 : i32
    %261 = tpu.dynamic_rotate %260 by %c127_i32_151 dim 1 : vector<8x128xf32>, i32 -> vector<8x128xf32>
    %cst_152 = arith.constant 0.000000e+00 : f32
    %262 = vector.broadcast %cst_152 : f32 to vector<8x128xf32>
    %263 = arith.select %185, %261, %262 : vector<8x128xi1>, vector<8x128xf32>
    %c1_153 = arith.constant 1 : index
    %c0_154 = arith.constant 0 : index
    %c0_155 = arith.constant 0 : index
    %264 = vector.load %arg8[%c1_153, %c0_154, %c0_155] : memref<4x8x128xf32, #tpu.memory_space<vmem>>, vector<1x8x128xf32>
    %265 = vector.shape_cast %264 : vector<1x8x128xf32> to vector<8x128xf32>
    %c120_i32_156 = arith.constant 120 : i32
    %266 = tpu.dynamic_rotate %265 by %c120_i32_156 dim 1 : vector<8x128xf32>, i32 -> vector<8x128xf32>
    %cst_157 = arith.constant 0.000000e+00 : f32
    %267 = vector.broadcast %cst_157 : f32 to vector<8x128xf32>
    %268 = arith.select %187, %266, %267 : vector<8x128xi1>, vector<8x128xf32>
    %c0_158 = arith.constant 0 : index
    %c0_159 = arith.constant 0 : index
    %c0_160 = arith.constant 0 : index
    %269 = vector.load %arg8[%c0_158, %c0_159, %c0_160] : memref<4x8x128xf32, #tpu.memory_space<vmem>>, vector<1x8x128xf32>
    %270 = vector.shape_cast %269 : vector<1x8x128xf32> to vector<8x128xf32>
    %c119_i32_161 = arith.constant 119 : i32
    %271 = tpu.dynamic_rotate %270 by %c119_i32_161 dim 1 : vector<8x128xf32>, i32 -> vector<8x128xf32>
    %272 = arith.andi %187, %185 : vector<8x128xi1>
    %cst_162 = arith.constant 0.000000e+00 : f32
    %273 = vector.broadcast %cst_162 : f32 to vector<8x128xf32>
    %274 = arith.select %272, %271, %273 : vector<8x128xi1>, vector<8x128xf32>
    %275 = tpu.concatenate %258, %263, %268, %274 in 0 : vector<8x128xf32>, vector<8x128xf32>, vector<8x128xf32>, vector<8x128xf32> -> vector<32x128xf32>
    %cst_163 = arith.constant dense<0.000000e+00> : vector<12x128xf32>
    %276 = tpu.matmul %147, %275, %cst_163 {dimension_numbers = #tpu.dot_dimension_numbers<[1], [0], [0], [1], [0, 0, 1, 1], [], []>} : vector<12x32xf32>, vector<32x128xf32>, vector<12x128xf32> -> vector<12x128xf32>
    %277 = arith.addf %276, %150 : vector<12x128xf32>
    %278 = arith.negf %277 : vector<12x128xf32>
    %279 = math.exp %278 : vector<12x128xf32>
    %cst_164 = arith.constant 1.000000e+00 : f32
    %280 = vector.broadcast %cst_164 : f32 to vector<12x128xf32>
    %281 = arith.addf %280, %279 : vector<12x128xf32>
    %282 = arith.divf %280, %281 : vector<12x128xf32>
    %c3_165 = arith.constant 3 : index
    %c0_166 = arith.constant 0 : index
    %c0_167 = arith.constant 0 : index
    %283 = vector.load %arg7[%c3_165, %c0_166, %c0_167] : memref<4x12x128xf32, #tpu.memory_space<vmem>>, vector<1x12x128xf32>
    %284 = vector.shape_cast %283 : vector<1x12x128xf32> to vector<12x128xf32>
    %285 = vector.shape_cast %282 : vector<12x128xf32> to vector<1x12x128xf32>
    tpu.vector_store %arg7[%c3_165, %c0_166, %c0_167], %285 {strides = array<i32>} : memref<4x12x128xf32, #tpu.memory_space<vmem>>, vector<1x12x128xf32>,
    return
  }
}

</mosaic_0001>

<bundles_post_ra>
// kernel: upconv_block_forward.1
= control target key start
LH: loop header
LB: loop body
LE: loop exit
PB: predicated region body
PF: predicated region fallthrough
CT: control target
= control target key end

     0   :  { %12 = vsyncpa [#allocation4], 0  ;;  %s886_s0 = inlined_call_operand.vmem [shape: f32[8,128], index: 0, kind: input, shape index: {}]   ;;  %s887_s1 = inlined_call_operand.hbm [shape: f32[32,32], index: 1, kind: input, shape index: {}]   ;;  %s888_s2 = inlined_call_operand.vmem [shape: f32[32,1], index: 2, kind: input, shape index: {}]   ;;  %s889_s3 = inlined_call_operand.vmem [shape: f32[8,1], index: 3, kind: input, shape index: {}]   ;;  %s890_s4 = inlined_call_operand.vmem [shape: f32[8,1], index: 4, kind: input, shape index: {}]   ;;  %s891_s5 = inlined_call_operand.hbm [shape: f32[12,32], index: 5, kind: input, shape index: {}]   ;;  %s892_s6 = inlined_call_operand.vmem [shape: f32[12,1], index: 6, kind: input, shape index: {}]   ;;  %s893_s7 = inlined_call_operand.vmem [shape: f32[4,12,128], index: 7, kind: output, shape index: {}]  }
   0x1   :  { %s20_s26 = sshll.u32 %s887_s1, 4  ;;  %s21_s26 = int_to_ptr.hbm [resolvable:$true] %s20_s26 }
   0x2   :  { %13 = vsyncpa [#allocation6], 0  ;;  %s700_s27 = smov [#allocation3]   ;;  %s39_s8 = sshll.u32 %s891_s5, 4  ;;  %s40_s8 = int_to_ptr.hbm [resolvable:$true] %s39_s8 }
   0x3   :  { %s22_s28 = sshll.u32 %s700_s27, 4  ;;  %s701_s9 = smov 128   ;;  %s23_s28 = int_to_ptr.vmem [resolvable:$true] %s22_s28 }
   0x4   :  { %s702_s10 = smov 8   ;;  %s703_s11 = smov [#allocation5]  }
   0x5   :  { %28 = dma.hbm_to_vmem [thread:$0]  %s21_s26, 512, %s23_s28, [#allocation4], %s701_s9, %s701_s9, %s702_s10  }
   0x6   :  { %s41_s12 = sshll.u32 %s703_s11, 4  ;;  %s42_s12 = int_to_ptr.vmem [resolvable:$true] %s41_s12 }
   0x7   :  { %47 = dma.hbm_to_vmem [thread:$0]  %s40_s8, 256, %s42_s12, [#allocation6], %s701_s9, %s701_s9, %s702_s10  }
   0x8   :  { %696 = dma.done.wait [#allocation4], 512  }
   0x9   :  { %697 = vsyncadd [#allocation4], 4294966784 }
   0xa   :  { %698 = dma.done.wait [#allocation6], 256  }
   0xb   :  { %699 = vsyncadd [#allocation6], 4294967040  ;;  %v114_v0 = vld [vmem:[%s886_s0] sm:$0xff]  ;;  %s704_s14 = smov 119   ;;  %s705_s5 = smov 127   ;;  %v86_v1 = vlaneseq  ;;  %v707_v6 = vmov 0  }
   0xc   :  { %121 = vrot.lane.b32.xlu0 %v114_v0, %s704_s14  ;;  %115 = vrot.lane.b32.xlu1 %v114_v0, %s705_s5  ;;  %s706_s15 = smov 120   ;;  %v62_v4 = vld [vmem:[%s888_s2] sm:$0xff]  ;;  %v65_v9 = vld [vmem:[%s888_s2 + $0x18] sm:$0xff]  ;;  %vm125_vm3 = vcmask 261120   ;;  %v59_v17 = vld [vmem:[#allocation3 + $0x8] sm:$0xff] }
   0xd   :  { %v87_v2 = vand.u32 127, %v86_v1  ;;  %611 = vset.pattern.permute.xlu1 %v707_v6  ;;  %613 = vset.pattern.permute.xlu0 %v707_v6  ;;  %v63_v10 = vld [vmem:[%s888_s2 + $0x8] sm:$0xff]  ;;  %v64_v12 = vld [vmem:[%s888_s2 + $0x10] sm:$0xff]  ;;  %v58_v15 = vld [vmem:[#allocation3] sm:$0xff] }
   0xe   :  { %612 = vset.pattern.permute.xlu2 %v707_v6  ;;  %v61_v16 = vld [vmem:[#allocation3 + $0x18] sm:$0xff]  ;;  %v60_v18 = vld [vmem:[#allocation3 + $0x10] sm:$0xff]  ;;  %v199_v58 = vld [vmem:[%s889_s3] sm:$0xff] }
   0xf   :  { %v92_v3 = vand.u32 63, %v87_v2  ;;  %73 = vperm.xlu2 %612, %v63_v10   ;;  %v212_v63 = vld [vmem:[%s890_s4] sm:$0xff] }
  0x11   :  { %v763_v5 = vand.u32 7, %v92_v3  ;;  %vm766_vm1 = vcmp.lt.s32.totalorder %v92_v3, 56 }
  0x13   :  { %vm112_vm0 = vcmp.ne.s32.totalorder %v763_v5, 7 }
  0x14   :  { %118 = vrot.lane.b32.xlu0 %v114_v0, %s706_s15  ;;  %68 = vperm.xlu1 %611, %v62_v4   ;;  %vm774_vm2 = vmand %vm766_vm1, %vm112_vm0 }
  0x17   :  { %78 = vperm.xlu2 %612, %v64_v12  }
  0x1c   :  { %83 = vperm.xlu0 %613, %v65_v9  }
  0x69   :  { %v74_v20 = vpop.permute.xlu2 %73 }
  0x71   :  { %v79_v30 = vpop.permute.xlu2 %78 }
  0x7e   :  { %v122_v11 = vpop.permute.xlu0 %121  ;;  %v116_v14 = vpop.permute.xlu1 %115 }
  0x7f   :  { %559 = vmatpush.msk.msra.mxu0 %vm774_vm2, %v122_v11  ;;  %595 = vmatpush.msk.msra.mxu2 %vm774_vm2, %v122_v11 }
  0x86   :  { %v119_v13 = vpop.permute.xlu0 %118  ;;  %v69_v21 = vpop.permute.xlu1 %68 }
  0x87   :  { %560 = vmatpush.msk.msra.mxu0 %vm766_vm1, %v119_v13  ;;  %596 = vmatpush.msk.msra.mxu2 %vm766_vm1, %v119_v13 }
  0x89   :  { %561 = vmatpush.msk.msra.mxu0 %vm112_vm0, %v116_v14  ;;  %597 = vmatpush.msk.msra.mxu2 %vm112_vm0, %v116_v14  ;;  %v241_v14 = vld [vmem:[#allocation5] sm:$0xff] }
  0x8b   :  { %153 = vmatpush.msra.mxu0 %v114_v0  ;;  %598 = vmatpush.msra.mxu2 %v114_v0 }
  0x8c   :  { %562 = vmatmul.msk.f32.vlgmr.msra.gmra.mxu0 %vm125_vm3, %v58_v15  ;;  %565 = vmatmul.msk.f32.vlgmr.msra.gmra.mxu2 %vm125_vm3, %v61_v16  ;;  %v812_v15 = vld [vmem:[#allocation5 + $0x8] sm:$0xf] }
  0x8d   :  { %v244_v16 = vld [vmem:[%s892_s6 + $0x8] sm:$0xf] }
  0x8e   :  { %v84_v24 = vpop.permute.xlu0 %83 }
  0x94   :  { %563 = vmatmul.msk.f32.gmra.mxu0 %vm125_vm3, %v59_v17  ;;  %v243_v17 = vld [vmem:[%s892_s6] sm:$0xff] }
  0x9c   :  { %564 = vmatmul.msk.f32.gmra.mxu0 %vm125_vm3, %v60_v18 }
 0x109   :  { %v155_v19 = vpop.f32.mrf.mxu0 }
 0x10a   :  { %v156_v26 = vadd.f32 %v155_v19, %v69_v21 }
 0x10c   :  { %v167_v29 = vmax.f32 %v156_v26, 0.0 }
 0x10e   :  { %v182_v35 = vmul.f32 %v167_v29, %v167_v29 }
 0x10f   :  { %v164_v25 = vpop.f32.mrf.mxu2 }
 0x110   :  { %v165_v28 = vadd.f32 %v164_v25, %v84_v24 }
 0x111   :  { %v158_v22 = vpop.f32.mrf.mxu0 }
 0x112   :  { %v159_v23 = vadd.f32 %v158_v22, %v74_v20  ;;  %v170_v34 = vmax.f32 %v165_v28, 0.0 }
 0x114   :  { %v168_v27 = vmax.f32 %v159_v23, 0.0  ;;  %v185_v40 = vmul.f32 %v170_v34, %v170_v34 }
 0x116   :  { %v183_v32 = vmul.f32 %v168_v27, %v168_v27  ;;  %v178_v37 = vadd.f32 %v168_v27, %v167_v29 }
 0x118   :  { %v186_v41 = vadd.f32 %v183_v32, %v182_v35 }
 0x119   :  { %v161_v31 = vpop.f32.mrf.mxu0 }
 0x11a   :  { %v162_v33 = vadd.f32 %v161_v31, %v79_v30 }
 0x11c   :  { %v169_v36 = vmax.f32 %v162_v33, 0.0 }
 0x11e   :  { %v179_v38 = vadd.f32 %v178_v37, %v169_v36  ;;  %v184_v39 = vmul.f32 %v169_v36, %v169_v36 }
 0x120   :  { %v180_v42 = vadd.f32 %v179_v38, %v170_v34  ;;  %v187_v43 = vadd.f32 %v186_v41, %v184_v39 }
 0x122   :  { %190 = vadd.xlane.f32.xlu1 %v180_v42  ;;  %v188_v44 = vadd.f32 %v187_v43, %v185_v40 }
 0x124   :  { %193 = vadd.xlane.f32.xlu2 %v188_v44 }
 0x195   :  { %v191_v45 = vpop.xlane.xlu1 %190 }
 0x196   :  { %v192_v46 = vmul.f32 0.001953125, %v191_v45 }
 0x197   :  { %v194_v47 = vpop.xlane.xlu2 %193 }
 0x198   :  { %v196_v48 = vmul.f32 %v192_v46, %v192_v46  ;;  %v195_v49 = vmul.f32 0.001953125, %v194_v47 }
 0x19a   :  { %v197_v50 = vsub.f32 %v195_v49, %v196_v48 }
 0x19c   :  { %v198_v51 = vmax.f32 %v197_v50, 0.0 }
 0x19e   :  { %v200_v52 = vadd.f32 1e-05, %v198_v51 }
 0x1a0   :  { %614 = vrsqrt.f32 %v200_v52  ;;  %vm207_vm5 = vweird.f32 %v200_v52 }
 0x1a6   :  { %v615_v53 = vpop.eup %614 }
 0x1a7   :  { %v202_v54 = vmul.f32 %v615_v53, %v200_v52  ;;  %vm208_vm4 = vweird.f32 %v615_v53 }
 0x1a8   :  { %vm209_vm6 = vmor %vm207_vm5, %vm208_vm4 }
 0x1a9   :  { %v203_v55 = vmul.f32 %v615_v53, %v202_v54 }
 0x1ab   :  { %v204_v56 = vmul.f32 0.5, %v203_v55 }
 0x1ad   :  { %v205_v57 = vsub.f32 1.5, %v204_v56 }
 0x1af   :  { %v206_v59 = vmul.f32 %v615_v53, %v205_v57 }
 0x1b1   :  { %v210_v60 = vsel %vm209_vm6, %v615_v53, %v206_v59 }
 0x1b2   :  { %v211_v61 = vmul.f32 %v210_v60, %v199_v58 }
 0x1b4   :  { %217 = vperm.xlu0 %613, %v211_v61   ;;  %v213_v62 = vmul.f32 %v211_v61, %v192_v46 }
 0x1b6   :  { %v214_v0 = vsub.f32 %v212_v63, %v213_v62 }
 0x1bc   :  { %222 = vperm.xlu0 %613, %v214_v0  }
 0x226   :  { %v218_v1 = vpop.permute.xlu0 %217 }
 0x227   :  { %v226_v2 = vmul.f32 %v218_v1, %v167_v29  ;;  %v234_v3 = vmul.f32 %v218_v1, %v169_v36  ;;  %v238_v4 = vmul.f32 %v218_v1, %v170_v34  ;;  %v230_v12 = vmul.f32 %v218_v1, %v168_v27 }
 0x22e   :  { %v223_v6 = vpop.permute.xlu0 %222 }
 0x22f   :  { %v227_v9 = vadd.f32 %v226_v2, %v223_v6  ;;  %v235_v10 = vadd.f32 %v234_v3, %v223_v6  ;;  %v239_v11 = vadd.f32 %v238_v4, %v223_v6  ;;  %v231_v13 = vadd.f32 %v230_v12, %v223_v6 }
 0x231   :  { %277 = vmatpush.msra.mxu1 %v239_v11  ;;  %599 = vmatpush.msra.mxu3 %v239_v11 }
 0x232   :  { %335 = vrot.lane.b32.xlu0 %v235_v10, %s705_s5  ;;  %330 = vrot.lane.b32.xlu1 %v227_v9, %s705_s5 }
 0x233   :  { %405 = vrot.lane.b32.xlu2 %v227_v9, %s706_s15  ;;  %278 = vmatpush.msra.mxu1 %v235_v10 }
 0x234   :  { %600 = vmatpush.msra.mxu3 %v235_v10 }
 0x235   :  { %279 = vmatpush.msra.mxu1 %v231_v13 }
 0x236   :  { %601 = vmatpush.msra.mxu3 %v231_v13 }
 0x237   :  { %280 = vmatpush.msra.mxu1 %v227_v9 }
 0x238   :  { %602 = vmatpush.msra.mxu3 %v227_v9  ;;  %566 = vmatmul.msk.f32.vlgmr.msra.gmra.mxu1 %vm125_vm3, %v241_v14 }
 0x239   :  { %567 = vmatmul.msk.f32.vlgmr.msra.gmra.mxu3 %vm125_vm3, %v812_v15 }
 0x23a   :  { %409 = vrot.lane.b32.xlu0 %v231_v13, %s706_s15  ;;  %252 = vperm.xlu1 %611, %v244_v16  }
 0x23b   :  { %247 = vperm.xlu2 %612, %v243_v17  }
 0x242   :  { %486 = vrot.lane.b32.xlu0 %v227_v9, %s704_s14 }
 0x24a   :  { %482 = vrot.lane.b32.xlu0 %v231_v13, %s706_s15 }
 0x252   :  { %478 = vrot.lane.b32.xlu0 %v235_v10, %s705_s5 }
 0x28d   :  { %v406_v20 = vpop.permute.xlu2 %405 }
 0x295   :  { %v839_v23 = vpop.permute.xlu2 %247 }
 0x2a4   :  { %v336_v18 = vpop.permute.xlu0 %335  ;;  %v331_v19 = vpop.permute.xlu1 %330 }
 0x2a5   :  { %570 = vmatpush.msk.msrb.mxu2 %vm112_vm0, %v336_v18 }
 0x2a7   :  { %351 = vmatpush.msrb.mxu2 %v239_v11 }
 0x2a9   :  { %571 = vmatpush.msk.msrb.mxu2 %vm112_vm0, %v331_v19 }
 0x2ab   :  { %353 = vmatpush.msrb.mxu2 %v231_v13 }
 0x2ac   :  { %v410_v21 = vpop.permute.xlu0 %409  ;;  %572 = vmatmul.msk.f32.vlgmr.msrb.gmra.mxu2 %vm125_vm3, %v241_v14  ;;  %v844_v27 = vpop.permute.xlu1 %252 }
 0x2ad   :  { %578 = vmatpush.msk.msrb.mxu3 %vm766_vm1, %v410_v21 }
 0x2af   :  { %579 = vmatpush.msk.msrb.mxu3 %vm766_vm1, %v406_v20 }
 0x2b1   :  { %426 = vmatpush.msrb.mxu3 %v239_v11 }
 0x2b3   :  { %427 = vmatpush.msrb.mxu3 %v235_v10 }
 0x2b4   :  { %v487_v22 = vpop.permute.xlu0 %486  ;;  %573 = vmatmul.msk.f32.gmra.mxu2 %vm125_vm3, %v812_v15  ;;  %580 = vmatmul.msk.f32.vlgmr.msrb.gmra.mxu3 %vm125_vm3, %v241_v14 }
 0x2b5   :  { %586 = vmatpush.msk.msrb.mxu1 %vm774_vm2, %v487_v22  ;;  %v282_v24 = vpop.f32.mrf.mxu1 }
 0x2b6   :  { %v283_v25 = vadd.f32 %v282_v24, %v839_v23 }
 0x2b8   :  { %v568_v26 = vmul.f32 -1.442695, %v283_v25 }
 0x2ba   :  { %616 = vpow2.f32 %v568_v26 }
 0x2bc   :  { %v483_v28 = vpop.permute.xlu0 %482  ;;  %v285_v29 = vpop.f32.mrf.mxu3  ;;  %581 = vmatmul.msk.f32.gmra.mxu3 %vm125_vm3, %v812_v15 }
 0x2bd   :  { %v286_v30 = vadd.f32 %v285_v29, %v844_v27  ;;  %587 = vmatpush.msk.msrb.mxu1 %vm766_vm1, %v483_v28 }
 0x2bf   :  { %v569_v31 = vmul.f32 -1.442695, %v286_v30 }
 0x2c0   :  { %v617_v8 = vpop.eup %616 }
 0x2c1   :  { %v294_v32 = vadd.f32 1.0, %v617_v8  ;;  %618 = vpow2.f32 %v569_v31 }
 0x2c3   :  { %620 = vrcp.f32 %v294_v32  ;;  %v307_v7 = vand.u32 2147483648, %v294_v32  ;;  %v305_v40 = vand.u32 2147483647, %v294_v32  ;;  %vm301_vm8 = vweird.f32 %v294_v32 }
 0x2c4   :  { %v479_v33 = vpop.permute.xlu0 %478 }
 0x2c5   :  { %588 = vmatpush.msk.msrb.mxu1 %vm112_vm0, %v479_v33  ;;  %v308_v5 = vor.u32 1.1754944e-38, %v307_v7  ;;  %vm306_vm10 = vcmp.eq.f32.partialorder %v305_v40, 8.507059e+37 }
 0x2c7   :  { %v619_v34 = vpop.eup %618  ;;  %504 = vmatpush.msrb.mxu1 %v239_v11 }
 0x2c8   :  { %v295_v35 = vadd.f32 1.0, %v619_v34  ;;  %589 = vmatmul.msk.f32.vlgmr.msrb.gmra.mxu1 %vm125_vm3, %v241_v14 }
 0x2c9   :  { %v621_v36 = vpop.eup %620 }
 0x2ca   :  { %v297_v37 = vmul.f32 %v621_v36, %v294_v32  ;;  %622 = vrcp.f32 %v295_v35  ;;  %vm302_vm7 = vweird.f32 %v621_v36  ;;  %v322_v47 = vand.u32 2147483648, %v295_v35 }
 0x2cb   :  { %vm303_vm9 = vmor %vm301_vm8, %vm302_vm7  ;;  %v320_v49 = vand.u32 2147483647, %v295_v35  ;;  %vm316_vm12 = vweird.f32 %v295_v35 }
 0x2cc   :  { %v298_v38 = vsub.f32 1.0, %v297_v37  ;;  %v323_v51 = vor.u32 1.1754944e-38, %v322_v47 }
 0x2cd   :  { %vm321_vm14 = vcmp.eq.f32.partialorder %v320_v49, 8.507059e+37 }
 0x2ce   :  { %v299_v39 = vmul.f32 %v621_v36, %v298_v38 }
 0x2d0   :  { %v623_v41 = vpop.eup %622  ;;  %v300_v42 = vadd.f32 %v621_v36, %v299_v39  ;;  %590 = vmatmul.msk.f32.gmra.mxu1 %vm125_vm3, %v812_v15 }
 0x2d1   :  { %v312_v43 = vmul.f32 %v623_v41, %v295_v35  ;;  %vm317_vm11 = vweird.f32 %v623_v41 }
 0x2d2   :  { %v304_v44 = vsel %vm303_vm9, %v621_v36, %v300_v42  ;;  %vm318_vm13 = vmor %vm316_vm12, %vm317_vm11 }
 0x2d3   :  { %v309_v45 = vsel %vm306_vm10, %v308_v5, %v304_v44  ;;  %v313_v46 = vsub.f32 1.0, %v312_v43 }
 0x2d4   :  { %326 = vst [vmem:[%s893_s7] sm:$0xff] %v309_v45 }
 0x2d5   :  { %v314_v48 = vmul.f32 %v623_v41, %v313_v46 }
 0x2d7   :  { %v315_v50 = vadd.f32 %v623_v41, %v314_v48 }
 0x2d9   :  { %v319_v52 = vsel %vm318_vm13, %v623_v41, %v315_v50 }
 0x2da   :  { %v324_v53 = vsel %vm321_vm14, %v323_v51, %v319_v52 }
 0x2db   :  { %327 = vst [vmem:[%s893_s7 + $0x8] sm:$0xf] %v324_v53 }
 0x32f   :  { %v355_v54 = vpop.f32.mrf.mxu2 }
 0x330   :  { %v356_v55 = vadd.f32 %v355_v54, %v839_v23 }
 0x332   :  { %v574_v56 = vmul.f32 -1.442695, %v356_v55 }
 0x334   :  { %624 = vpow2.f32 %v574_v56 }
 0x337   :  { %v358_v57 = vpop.f32.mrf.mxu2  ;;  %v429_v58 = vpop.f32.mrf.mxu3 }
 0x338   :  { %v359_v59 = vadd.f32 %v358_v57, %v844_v27  ;;  %v430_v60 = vadd.f32 %v429_v58, %v839_v23 }
 0x33a   :  { %v625_v61 = vpop.eup %624  ;;  %v575_v62 = vmul.f32 -1.442695, %v359_v59  ;;  %v582_v63 = vmul.f32 -1.442695, %v430_v60 }
 0x33b   :  { %v367_v0 = vadd.f32 1.0, %v625_v61 }
 0x33c   :  { %626 = vpow2.f32 %v575_v62 }
 0x33d   :  { %628 = vrcp.f32 %v367_v0  ;;  %v380_v16 = vand.u32 2147483648, %v367_v0  ;;  %v378_v18 = vand.u32 2147483647, %v367_v0  ;;  %vm374_vm0 = vweird.f32 %v367_v0 }
 0x33e   :  { %630 = vpow2.f32 %v582_v63 }
 0x33f   :  { %v432_v1 = vpop.f32.mrf.mxu3  ;;  %v381_v24 = vor.u32 1.1754944e-38, %v380_v16  ;;  %vm379_vm2 = vcmp.eq.f32.partialorder %v378_v18, 8.507059e+37 }
 0x340   :  { %v433_v2 = vadd.f32 %v432_v1, %v844_v27 }
 0x342   :  { %v627_v3 = vpop.eup %626  ;;  %v583_v4 = vmul.f32 -1.442695, %v433_v2 }
 0x343   :  { %v629_v6 = vpop.eup %628  ;;  %v368_v9 = vadd.f32 1.0, %v627_v3 }
 0x344   :  { %v631_v10 = vpop.eup %630  ;;  %v370_v11 = vmul.f32 %v629_v6, %v367_v0  ;;  %632 = vpow2.f32 %v583_v4  ;;  %vm375_vm15 = vweird.f32 %v629_v6 }
 0x345   :  { %634 = vrcp.f32 %v368_v9  ;;  %v506_v12 = vpop.f32.mrf.mxu1  ;;  %v441_v14 = vadd.f32 1.0, %v631_v10  ;;  %vm376_vm1 = vmor %vm374_vm0, %vm375_vm15  ;;  %v395_v32 = vand.u32 2147483648, %v368_v9  ;;  %v393_v35 = vand.u32 2147483647, %v368_v9 }
 0x346   :  { %v371_v13 = vsub.f32 1.0, %v370_v11  ;;  %v507_v15 = vadd.f32 %v506_v12, %v839_v23  ;;  %vm389_vm4 = vweird.f32 %v368_v9 }
 0x347   :  { %636 = vrcp.f32 %v441_v14  ;;  %v454_v39 = vand.u32 2147483648, %v441_v14  ;;  %v396_v42 = vor.u32 1.1754944e-38, %v395_v32  ;;  %v452_v43 = vand.u32 2147483647, %v441_v14 }
 0x348   :  { %v372_v17 = vmul.f32 %v629_v6, %v371_v13  ;;  %v591_v19 = vmul.f32 -1.442695, %v507_v15  ;;  %vm394_vm7 = vcmp.eq.f32.partialorder %v393_v35, 8.507059e+37  ;;  %vm448_vm8 = vweird.f32 %v441_v14 }
 0x349   :  { %v455_v47 = vor.u32 1.1754944e-38, %v454_v39  ;;  %vm453_vm10 = vcmp.eq.f32.partialorder %v452_v43, 8.507059e+37 }
 0x34a   :  { %v633_v20 = vpop.eup %632  ;;  %v373_v21 = vadd.f32 %v629_v6, %v372_v17  ;;  %638 = vpow2.f32 %v591_v19 }
 0x34b   :  { %v635_v22 = vpop.eup %634  ;;  %v442_v25 = vadd.f32 1.0, %v633_v20 }
 0x34c   :  { %v377_v26 = vsel %vm376_vm1, %v629_v6, %v373_v21  ;;  %v385_v28 = vmul.f32 %v635_v22, %v368_v9  ;;  %vm390_vm3 = vweird.f32 %v635_v22 }
 0x34d   :  { %v382_v29 = vsel %vm379_vm2, %v381_v24, %v377_v26  ;;  %640 = vrcp.f32 %v442_v25  ;;  %v509_v23 = vpop.f32.mrf.mxu1  ;;  %v637_v30 = vpop.eup %636  ;;  %vm391_vm5 = vmor %vm389_vm4, %vm390_vm3  ;;  %v469_v50 = vand.u32 2147483648, %v442_v25  ;;  %v467_v54 = vand.u32 2147483647, %v442_v25 }
 0x34e   :  { %576 = vst [vmem:[%s893_s7 + $0x10] sm:$0xff] %v382_v29  ;;  %v386_v31 = vsub.f32 1.0, %v385_v28  ;;  %v510_v8 = vadd.f32 %v509_v23, %v844_v27  ;;  %v444_v33 = vmul.f32 %v637_v30, %v441_v14  ;;  %vm449_vm6 = vweird.f32 %v637_v30 }
 0x34f   :  { %vm450_vm9 = vmor %vm448_vm8, %vm449_vm6  ;;  %vm463_vm12 = vweird.f32 %v442_v25  ;;  %v470_v58 = vor.u32 1.1754944e-38, %v469_v50  ;;  %vm468_vm14 = vcmp.eq.f32.partialorder %v467_v54, 8.507059e+37 }
 0x350   :  { %v387_v34 = vmul.f32 %v635_v22, %v386_v31  ;;  %v592_v36 = vmul.f32 -1.442695, %v510_v8  ;;  %v639_v37 = vpop.eup %638  ;;  %v445_v38 = vsub.f32 1.0, %v444_v33 }
 0x351   :  { %v518_v40 = vadd.f32 1.0, %v639_v37 }
 0x352   :  { %v388_v7 = vadd.f32 %v635_v22, %v387_v34  ;;  %642 = vpow2.f32 %v592_v36  ;;  %v446_v5 = vmul.f32 %v637_v30, %v445_v38 }
 0x353   :  { %v641_v41 = vpop.eup %640  ;;  %644 = vrcp.f32 %v518_v40  ;;  %v531_v63 = vand.u32 2147483648, %v518_v40  ;;  %v529_v1 = vand.u32 2147483647, %v518_v40  ;;  %vm525_vm0 = vweird.f32 %v518_v40 }
 0x354   :  { %v392_v27 = vsel %vm391_vm5, %v635_v22, %v388_v7  ;;  %v459_v44 = vmul.f32 %v641_v41, %v442_v25  ;;  %v447_v46 = vadd.f32 %v637_v30, %v446_v5  ;;  %vm464_vm11 = vweird.f32 %v641_v41 }
 0x355   :  { %v397_v45 = vsel %vm394_vm7, %v396_v42, %v392_v27  ;;  %vm465_vm13 = vmor %vm463_vm12, %vm464_vm11  ;;  %v532_v4 = vor.u32 1.1754944e-38, %v531_v63  ;;  %vm530_vm2 = vcmp.eq.f32.partialorder %v529_v1, 8.507059e+37 }
 0x356   :  { %577 = vst [vmem:[%s893_s7 + $0x18] sm:$0xf] %v397_v45  ;;  %v460_v48 = vsub.f32 1.0, %v459_v44  ;;  %v451_v49 = vsel %vm450_vm9, %v637_v30, %v447_v46 }
 0x357   :  { %v456_v52 = vsel %vm453_vm10, %v455_v47, %v451_v49 }
 0x358   :  { %v643_v51 = vpop.eup %642  ;;  %v461_v53 = vmul.f32 %v641_v41, %v460_v48  ;;  %584 = vst [vmem:[%s893_s7 + $0x20] sm:$0xff] %v456_v52 }
 0x359   :  { %v519_v55 = vadd.f32 1.0, %v643_v51  ;;  %v645_v56 = vpop.eup %644 }
 0x35a   :  { %v462_v57 = vadd.f32 %v641_v41, %v461_v53  ;;  %v521_v59 = vmul.f32 %v645_v56, %v518_v40  ;;  %vm526_vm15 = vweird.f32 %v645_v56 }
 0x35b   :  { %646 = vrcp.f32 %v519_v55  ;;  %vm527_vm1 = vmor %vm525_vm0, %vm526_vm15  ;;  %v546_v12 = vand.u32 2147483648, %v519_v55  ;;  %v544_v14 = vand.u32 2147483647, %v519_v55  ;;  %vm540_vm4 = vweird.f32 %v519_v55 }
 0x35c   :  { %v466_v60 = vsel %vm465_vm13, %v641_v41, %v462_v57  ;;  %v522_v62 = vsub.f32 1.0, %v521_v59 }
 0x35d   :  { %v471_v61 = vsel %vm468_vm14, %v470_v58, %v466_v60  ;;  %v547_v16 = vor.u32 1.1754944e-38, %v546_v12  ;;  %vm545_vm6 = vcmp.eq.f32.partialorder %v544_v14, 8.507059e+37 }
 0x35e   :  { %585 = vst [vmem:[%s893_s7 + $0x28] sm:$0xf] %v471_v61  ;;  %v523_v0 = vmul.f32 %v645_v56, %v522_v62 }
 0x360   :  { %v524_v3 = vadd.f32 %v645_v56, %v523_v0 }
 0x361   :  { %v647_v2 = vpop.eup %646 }
 0x362   :  { %v536_v6 = vmul.f32 %v647_v2, %v519_v55  ;;  %v528_v9 = vsel %vm527_vm1, %v645_v56, %v524_v3  ;;  %vm541_vm3 = vweird.f32 %v647_v2 }
 0x363   :  { %v533_v10 = vsel %vm530_vm2, %v532_v4, %v528_v9  ;;  %vm542_vm5 = vmor %vm540_vm4, %vm541_vm3 }
 0x364   :  { %v537_v11 = vsub.f32 1.0, %v536_v6  ;;  %593 = vst [vmem:[%s893_s7 + $0x30] sm:$0xff] %v533_v10 }
 0x366   :  { %v538_v13 = vmul.f32 %v647_v2, %v537_v11 }
 0x368   :  { %v539_v15 = vadd.f32 %v647_v2, %v538_v13 }
 0x36a   :  { %v543_v17 = vsel %vm542_vm5, %v647_v2, %v539_v15 }
 0x36b   :  { %v548_v18 = vsel %vm545_vm6, %v547_v16, %v543_v17 }
 0x36c   :  { %594 = vst [vmem:[%s893_s7 + $0x38] sm:$0xf] %v548_v18 }
 0x36d   :  { %557 = vsyncpa [#allocation4], 1 }
 0x36e   :  { %558 = vsyncpa [#allocation6], 1 }

</bundles_post_ra>
